<compile_context>
chip_gen: v7x
topology: tpu7x:2x2x1
jax: 0.10.0
libtpu: 0.0.40
codegen_flags: <defaults>
</compile_context>

<pallas_src>
import functools

import jax
import jax.numpy as jnp
from jax.experimental import pallas as pl
from jax.experimental.pallas import tpu as pltpu


def _round_up(n, m):
    return ((n + m - 1) // m) * m


def _imu_mlp_kernel(x_ref,
                    w1_ref, c1_ref,
                    w2_ref, c2_ref,
                    w3_ref, c3_ref,
                    w4_ref, c4_ref,
                    w5_ref, b5_ref,
                    o_ref):
    """Fused forward for one batch tile: 4x (Linear[BN-folded] -> ReLU) + Linear."""

    def layer(h, w_ref, c_ref, relu):
        y = jnp.dot(h.astype(jnp.bfloat16), w_ref[...],
                    preferred_element_type=jnp.float32)   # bf16 MXU, f32 accum
        y = y + c_ref[...]                                 # folded BN shift / bias (f32)
        return jnp.maximum(y, 0.0) if relu else y

    h = x_ref[...]                                # [tile_b, d_in] bf16
    h = layer(h, w1_ref, c1_ref, True)            # MLP1: Linear -> BN -> ReLU
    h = layer(h, w2_ref, c2_ref, True)            # MLP1: Linear -> BN -> ReLU
    # Dropout(0.5): identity in eval mode
    h = layer(h, w3_ref, c3_ref, True)            # MLP2: Linear -> BN -> ReLU
    h = layer(h, w4_ref, c4_ref, True)            # MLP2: Linear -> BN -> ReLU
    o_ref[...] = layer(h, w5_ref, b5_ref, False)  # final Linear (lane-padded)


@functools.partial(jax.jit, static_argnames=("out_dim", "tile_b"))
def imu_mlp_forward(x, prep, *, out_dim, tile_b=512):
    """x: [B, ...] float32; prep: folded/cast/padded operands from prepare_operands."""
    B = x.shape[0]
    x2d = x.reshape(B, -1).astype(jnp.bfloat16)   # matches torch x.view(B, -1)
    d_in = x2d.shape[1]
    out_pad = prep["w5"].shape[1]

    # Batch tiling: tile_b rows per grid step (multiple of 8 sublanes).
    tile_b = max(8, min(tile_b, _round_up(B, 8)))
    tile_b = _round_up(tile_b, 8)
    b_pad = _round_up(B, tile_b)
    if b_pad != B:
        x2d = jnp.pad(x2d, ((0, b_pad - B), (0, 0)))
    n_tiles = b_pad // tile_b

    weights = (prep["w1"], prep["c1"], prep["w2"], prep["c2"],
               prep["w3"], prep["c3"], prep["w4"], prep["c4"],
               prep["w5"], prep["b5"])

    x_spec = pl.BlockSpec((tile_b, d_in), lambda i: (i, 0))
    # Constant index_map -> each weight/shift is fetched once and stays
    # resident in VMEM across grid steps.
    w_specs = [pl.BlockSpec(w.shape, lambda i: (0, 0)) for w in weights]
    out_spec = pl.BlockSpec((tile_b, out_pad), lambda i: (i, 0))

    # Advisory cost estimate so XLA can schedule around the custom call.
    mm_shapes = [prep["w1"].shape, prep["w2"].shape, prep["w3"].shape,
                 prep["w4"].shape, prep["w5"].shape]
    flops = 2 * b_pad * sum(din * dout for din, dout in mm_shapes)
    weight_bytes = sum(int(w.size) * w.dtype.itemsize for w in weights)
    bytes_accessed = (b_pad * d_in * 2) + weight_bytes + (b_pad * out_pad * 4)
    cost = pl.CostEstimate(flops=flops, transcendentals=0,
                           bytes_accessed=bytes_accessed)

    # VMEM budget: double-buffered x + out tiles plus resident weights, with
    # headroom; capped well below the v7x 64 MiB per-TC VMEM.
    vmem_bytes = 2 * tile_b * d_in * 2 + 2 * tile_b * out_pad * 4 + weight_bytes
    vmem_limit = min(max(4 * vmem_bytes, 16 * 1024 * 1024), 48 * 1024 * 1024)

    out = pl.pallas_call(
        _imu_mlp_kernel,
        out_shape=jax.ShapeDtypeStruct((b_pad, out_pad), jnp.float32),
        grid_spec=pl.GridSpec(
            grid=(n_tiles,),
            in_specs=[x_spec] + w_specs,
            out_specs=out_spec,
        ),
        compiler_params=pltpu.CompilerParams(
            dimension_semantics=("parallel",),    # megacore-shard batch on v7x
            vmem_limit_bytes=vmem_limit,
        ),
        cost_estimate=cost,
    )(x2d, *weights)

    return out[:B, :out_dim]


def make_params(key, input_size, hidden_size, output_size):
    """Synthetic f32 parameters matching IMU_MLP's layer shapes (fresh-module BN)."""
    h4 = hidden_size // 4
    h16 = hidden_size // 16
    dims = [(input_size, hidden_size),   # MLP1.Linear1
            (hidden_size, h4),           # MLP1.Linear2
            (h4, h4),                    # MLP2.Linear1
            (h4, h16),                   # MLP2.Linear2
            (h16, output_size)]          # final Linear

    keys = jax.random.split(key, 2 * len(dims))
    params = {}
    for idx, (din, dout) in enumerate(dims, start=1):
        kw, kb = keys[2 * (idx - 1)], keys[2 * (idx - 1) + 1]
        # weight stored pre-transposed to [in, out] so the kernel does x @ W
        params[f"w{idx}"] = (jax.random.normal(kw, (din, dout), jnp.float32)
                             / jnp.sqrt(jnp.float32(din)))
        params[f"b{idx}"] = jax.random.normal(kb, (dout,), jnp.float32) * 0.1
        if idx < 5:
            # fresh-module BatchNorm1d: gamma=1, beta=0, running mean=0, var=1
            params[f"gamma{idx}"] = jnp.ones((dout,), jnp.float32)
            params[f"beta{idx}"] = jnp.zeros((dout,), jnp.float32)
            params[f"mean{idx}"] = jnp.zeros((dout,), jnp.float32)
            params[f"var{idx}"] = jnp.ones((dout,), jnp.float32)
    return params


def prepare_operands(params, eps=1e-5, lane_pad=128):
    """Fold eval-mode BN into each Linear, cast to bf16, and zero-pad every
    feature dim (except the raw input dim) to a multiple of `lane_pad` so all
    intermediate activations / the output are lane-dense.

    Zero padding is exact: padded output columns get weight-col=0 and shift=0,
    so they are 0 before and after ReLU, and the matching padded input rows of
    the next weight are 0, contributing nothing to the next layer.
    """
    def fold(i):
        scale = params[f"gamma{i}"] / jnp.sqrt(params[f"var{i}"] + eps)
        shift = (params[f"b{i}"] - params[f"mean{i}"]) * scale + params[f"beta{i}"]
        return params[f"w{i}"] * scale[None, :], shift

    folded = [fold(i) for i in range(1, 5)]
    folded.append((params["w5"], params["b5"]))

    prep = {}
    in_pad_prev = folded[0][0].shape[0]          # raw input dim: not padded
    for idx, (w, c) in enumerate(folded, start=1):
        din, dout = w.shape
        dout_pad = _round_up(dout, lane_pad)
        wp = jnp.zeros((in_pad_prev, dout_pad), jnp.float32)
        wp = wp.at[:din, :dout].set(w)
        cp = jnp.zeros((1, dout_pad), jnp.float32).at[0, :dout].set(c)
        prep[f"w{idx}"] = wp.astype(jnp.bfloat16)
        key = f"c{idx}" if idx < 5 else "b5"
        prep[key] = cp                            # f32 shift / bias
        in_pad_prev = dout_pad

    out_dim = params["w5"].shape[1]
    return prep, out_dim


def _reference_forward(x, prep, out_dim):
    """Pure-JAX reference using the same prepared (folded, bf16, padded) operands."""
    h = x.reshape(x.shape[0], -1)
    for i in range(1, 5):
        y = jnp.dot(h.astype(jnp.bfloat16), prep[f"w{i}"],
                    preferred_element_type=jnp.float32) + prep[f"c{i}"]
        h = jnp.maximum(y, 0.0)
    y = jnp.dot(h.astype(jnp.bfloat16), prep["w5"],
                preferred_element_type=jnp.float32) + prep["b5"]
    return y[:, :out_dim]


if __name__ == "__main__":
    key = jax.random.PRNGKey(0)
    k_x, k_p = jax.random.split(key)

    # Small, forward-consistent shapes:
    #   x: [batch=32, channels=6, seq=32] -> flattened input_size = 192
    #   hidden_size = 64 -> hidden/4 = 16, hidden/16 = 4 ; output_size = 8
    batch, channels, seq = 32, 6, 32
    input_size = channels * seq
    hidden_size, output_size = 64, 8

    x = jax.random.normal(k_x, (batch, channels, seq), jnp.float32)
    params = make_params(k_p, input_size, hidden_size, output_size)
    prep, out_dim = prepare_operands(params)

    # tile_b=8 exercises the multi-step, weight-resident pipelined path even at
    # this small batch; production batches should use the default tile_b=512.
    out = imu_mlp_forward(x, prep, out_dim=out_dim, tile_b=8)
    out = jax.block_until_ready(out)

    ref = _reference_forward(x, prep, out_dim)
    assert out.shape == (batch, output_size)
    assert jnp.allclose(out, ref, atol=5e-3, rtol=5e-3), (
        float(jnp.max(jnp.abs(out - ref))))

    print("KERNEL_OK")
</pallas_src>

<mosaic_0001>
module attributes {stable_mosaic.version = 11 : i64} {
  func.func @_imu_mlp_kernel(%arg0: i32, %arg1: memref<8x192xbf16, #tpu.memory_space<vmem>>, %arg2: memref<192x128xbf16, #tpu.memory_space<vmem>>, %arg3: memref<1x128xf32, #tpu.memory_space<vmem>>, %arg4: memref<128x128xbf16, #tpu.memory_space<vmem>>, %arg5: memref<1x128xf32, #tpu.memory_space<vmem>>, %arg6: memref<128x128xbf16, #tpu.memory_space<vmem>>, %arg7: memref<1x128xf32, #tpu.memory_space<vmem>>, %arg8: memref<128x128xbf16, #tpu.memory_space<vmem>>, %arg9: memref<1x128xf32, #tpu.memory_space<vmem>>, %arg10: memref<128x128xbf16, #tpu.memory_space<vmem>>, %arg11: memref<1x128xf32, #tpu.memory_space<vmem>>, %arg12: memref<8x128xf32, #tpu.memory_space<vmem>>) attributes {dimension_semantics = [#tpu.dimension_semantics<parallel>], iteration_bounds = array<i64: 4>, scalar_prefetch = 0 : i64, scratch_operands = 0 : i64, tpu.core_type = #tpu.core_type<tc>, window_params = [{transform_indices = @transform_0, window_bounds = array<i64: 8, 192>}, {pipeline_mode = #tpu.pipeline_mode<synchronous>, transform_indices = @transform_1, window_bounds = array<i64: 192, 128>}, {pipeline_mode = #tpu.pipeline_mode<synchronous>, transform_indices = @transform_2, window_bounds = array<i64: 1, 128>}, {pipeline_mode = #tpu.pipeline_mode<synchronous>, transform_indices = @transform_3, window_bounds = array<i64: 128, 128>}, {pipeline_mode = #tpu.pipeline_mode<synchronous>, transform_indices = @transform_4, window_bounds = array<i64: 1, 128>}, {pipeline_mode = #tpu.pipeline_mode<synchronous>, transform_indices = @transform_5, window_bounds = array<i64: 128, 128>}, {pipeline_mode = #tpu.pipeline_mode<synchronous>, transform_indices = @transform_6, window_bounds = array<i64: 1, 128>}, {pipeline_mode = #tpu.pipeline_mode<synchronous>, transform_indices = @transform_7, window_bounds = array<i64: 128, 128>}, {pipeline_mode = #tpu.pipeline_mode<synchronous>, transform_indices = @transform_8, window_bounds = array<i64: 1, 128>}, {pipeline_mode = #tpu.pipeline_mode<synchronous>, transform_indices = @transform_9, window_bounds = array<i64: 128, 128>}, {pipeline_mode = #tpu.pipeline_mode<synchronous>, transform_indices = @transform_10, window_bounds = array<i64: 1, 128>}, {transform_indices = @transform_11, window_bounds = array<i64: 8, 128>}]} {
    %c0 = arith.constant 0 : index
    %c0_0 = arith.constant 0 : index
    %0 = vector.load %arg1[%c0, %c0_0] : memref<8x192xbf16, #tpu.memory_space<vmem>>, vector<8x192xbf16>
    %c0_1 = arith.constant 0 : index
    %c0_2 = arith.constant 0 : index
    %1 = vector.load %arg2[%c0_1, %c0_2] : memref<192x128xbf16, #tpu.memory_space<vmem>>, vector<192x128xbf16>
    %cst = arith.constant dense<0.000000e+00> : vector<8x128xf32>
    %2 = tpu.matmul %0, %1, %cst {dimension_numbers = #tpu.dot_dimension_numbers<[1], [0], [0], [1], [0, 0, 1, 1], [], []>} : vector<8x192xbf16>, vector<192x128xbf16>, vector<8x128xf32> -> vector<8x128xf32>
    %c0_3 = arith.constant 0 : index
    %c0_4 = arith.constant 0 : index
    %3 = vector.load %arg3[%c0_3, %c0_4] : memref<1x128xf32, #tpu.memory_space<vmem>>, vector<1x128xf32>
    %4 = vector.broadcast %3 : vector<1x128xf32> to vector<8x128xf32>
    %5 = arith.addf %2, %4 : vector<8x128xf32>
    %cst_5 = arith.constant 0.000000e+00 : f32
    %6 = vector.broadcast %cst_5 : f32 to vector<8x128xf32>
    %7 = arith.maximumf %5, %6 : vector<8x128xf32>
    %8 = arith.truncf %7 : vector<8x128xf32> to vector<8x128xbf16>
    %c0_6 = arith.constant 0 : index
    %c0_7 = arith.constant 0 : index
    %9 = vector.load %arg4[%c0_6, %c0_7] : memref<128x128xbf16, #tpu.memory_space<vmem>>, vector<128x128xbf16>
    %cst_8 = arith.constant dense<0.000000e+00> : vector<8x128xf32>
    %10 = tpu.matmul %8, %9, %cst_8 {dimension_numbers = #tpu.dot_dimension_numbers<[1], [0], [0], [1], [0, 0, 1, 1], [], []>} : vector<8x128xbf16>, vector<128x128xbf16>, vector<8x128xf32> -> vector<8x128xf32>
    %c0_9 = arith.constant 0 : index
    %c0_10 = arith.constant 0 : index
    %11 = vector.load %arg5[%c0_9, %c0_10] : memref<1x128xf32, #tpu.memory_space<vmem>>, vector<1x128xf32>
    %12 = vector.broadcast %11 : vector<1x128xf32> to vector<8x128xf32>
    %13 = arith.addf %10, %12 : vector<8x128xf32>
    %cst_11 = arith.constant 0.000000e+00 : f32
    %14 = vector.broadcast %cst_11 : f32 to vector<8x128xf32>
    %15 = arith.maximumf %13, %14 : vector<8x128xf32>
    %16 = arith.truncf %15 : vector<8x128xf32> to vector<8x128xbf16>
    %c0_12 = arith.constant 0 : index
    %c0_13 = arith.constant 0 : index
    %17 = vector.load %arg6[%c0_12, %c0_13] : memref<128x128xbf16, #tpu.memory_space<vmem>>, vector<128x128xbf16>
    %cst_14 = arith.constant dense<0.000000e+00> : vector<8x128xf32>
    %18 = tpu.matmul %16, %17, %cst_14 {dimension_numbers = #tpu.dot_dimension_numbers<[1], [0], [0], [1], [0, 0, 1, 1], [], []>} : vector<8x128xbf16>, vector<128x128xbf16>, vector<8x128xf32> -> vector<8x128xf32>
    %c0_15 = arith.constant 0 : index
    %c0_16 = arith.constant 0 : index
    %19 = vector.load %arg7[%c0_15, %c0_16] : memref<1x128xf32, #tpu.memory_space<vmem>>, vector<1x128xf32>
    %20 = vector.broadcast %19 : vector<1x128xf32> to vector<8x128xf32>
    %21 = arith.addf %18, %20 : vector<8x128xf32>
    %cst_17 = arith.constant 0.000000e+00 : f32
    %22 = vector.broadcast %cst_17 : f32 to vector<8x128xf32>
    %23 = arith.maximumf %21, %22 : vector<8x128xf32>
    %24 = arith.truncf %23 : vector<8x128xf32> to vector<8x128xbf16>
    %c0_18 = arith.constant 0 : index
    %c0_19 = arith.constant 0 : index
    %25 = vector.load %arg8[%c0_18, %c0_19] : memref<128x128xbf16, #tpu.memory_space<vmem>>, vector<128x128xbf16>
    %cst_20 = arith.constant dense<0.000000e+00> : vector<8x128xf32>
    %26 = tpu.matmul %24, %25, %cst_20 {dimension_numbers = #tpu.dot_dimension_numbers<[1], [0], [0], [1], [0, 0, 1, 1], [], []>} : vector<8x128xbf16>, vector<128x128xbf16>, vector<8x128xf32> -> vector<8x128xf32>
    %c0_21 = arith.constant 0 : index
    %c0_22 = arith.constant 0 : index
    %27 = vector.load %arg9[%c0_21, %c0_22] : memref<1x128xf32, #tpu.memory_space<vmem>>, vector<1x128xf32>
    %28 = vector.broadcast %27 : vector<1x128xf32> to vector<8x128xf32>
    %29 = arith.addf %26, %28 : vector<8x128xf32>
    %cst_23 = arith.constant 0.000000e+00 : f32
    %30 = vector.broadcast %cst_23 : f32 to vector<8x128xf32>
    %31 = arith.maximumf %29, %30 : vector<8x128xf32>
    %32 = arith.truncf %31 : vector<8x128xf32> to vector<8x128xbf16>
    %c0_24 = arith.constant 0 : index
    %c0_25 = arith.constant 0 : index
    %33 = vector.load %arg10[%c0_24, %c0_25] : memref<128x128xbf16, #tpu.memory_space<vmem>>, vector<128x128xbf16>
    %cst_26 = arith.constant dense<0.000000e+00> : vector<8x128xf32>
    %34 = tpu.matmul %32, %33, %cst_26 {dimension_numbers = #tpu.dot_dimension_numbers<[1], [0], [0], [1], [0, 0, 1, 1], [], []>} : vector<8x128xbf16>, vector<128x128xbf16>, vector<8x128xf32> -> vector<8x128xf32>
    %c0_27 = arith.constant 0 : index
    %c0_28 = arith.constant 0 : index
    %35 = vector.load %arg11[%c0_27, %c0_28] : memref<1x128xf32, #tpu.memory_space<vmem>>, vector<1x128xf32>
    %36 = vector.broadcast %35 : vector<1x128xf32> to vector<8x128xf32>
    %37 = arith.addf %34, %36 : vector<8x128xf32>
    %c0_29 = arith.constant 0 : index
    %c0_30 = arith.constant 0 : index
    %38 = vector.load %arg12[%c0_29, %c0_30] : memref<8x128xf32, #tpu.memory_space<vmem>>, vector<8x128xf32>
    tpu.vector_store %arg12[%c0_29, %c0_30], %37 {strides = array<i32>} : memref<8x128xf32, #tpu.memory_space<vmem>>, vector<8x128xf32>,
    return
  }
  func.func @transform_0(%arg0: i32) -> (i32, i32) {
    %c0_i32 = arith.constant 0 : i32
    %c0_i32_0 = arith.constant 0 : i32
    return %arg0, %c0_i32 : i32, i32
  }
  func.func @transform_1(%arg0: i32) -> (i32, i32) {
    %c0_i32 = arith.constant 0 : i32
    %c0_i32_0 = arith.constant 0 : i32
    %c0_i32_1 = arith.constant 0 : i32
    return %c0_i32, %c0_i32_0 : i32, i32
  }
  func.func @transform_2(%arg0: i32) -> (i32, i32) {
    %c0_i32 = arith.constant 0 : i32
    %c0_i32_0 = arith.constant 0 : i32
    %c0_i32_1 = arith.constant 0 : i32
    return %c0_i32, %c0_i32_0 : i32, i32
  }
  func.func @transform_3(%arg0: i32) -> (i32, i32) {
    %c0_i32 = arith.constant 0 : i32
    %c0_i32_0 = arith.constant 0 : i32
    %c0_i32_1 = arith.constant 0 : i32
    return %c0_i32, %c0_i32_0 : i32, i32
  }
  func.func @transform_4(%arg0: i32) -> (i32, i32) {
    %c0_i32 = arith.constant 0 : i32
    %c0_i32_0 = arith.constant 0 : i32
    %c0_i32_1 = arith.constant 0 : i32
    return %c0_i32, %c0_i32_0 : i32, i32
  }
  func.func @transform_5(%arg0: i32) -> (i32, i32) {
    %c0_i32 = arith.constant 0 : i32
    %c0_i32_0 = arith.constant 0 : i32
    %c0_i32_1 = arith.constant 0 : i32
    return %c0_i32, %c0_i32_0 : i32, i32
  }
  func.func @transform_6(%arg0: i32) -> (i32, i32) {
    %c0_i32 = arith.constant 0 : i32
    %c0_i32_0 = arith.constant 0 : i32
    %c0_i32_1 = arith.constant 0 : i32
    return %c0_i32, %c0_i32_0 : i32, i32
  }
  func.func @transform_7(%arg0: i32) -> (i32, i32) {
    %c0_i32 = arith.constant 0 : i32
    %c0_i32_0 = arith.constant 0 : i32
    %c0_i32_1 = arith.constant 0 : i32
    return %c0_i32, %c0_i32_0 : i32, i32
  }
  func.func @transform_8(%arg0: i32) -> (i32, i32) {
    %c0_i32 = arith.constant 0 : i32
    %c0_i32_0 = arith.constant 0 : i32
    %c0_i32_1 = arith.constant 0 : i32
    return %c0_i32, %c0_i32_0 : i32, i32
  }
  func.func @transform_9(%arg0: i32) -> (i32, i32) {
    %c0_i32 = arith.constant 0 : i32
    %c0_i32_0 = arith.constant 0 : i32
    %c0_i32_1 = arith.constant 0 : i32
    return %c0_i32, %c0_i32_0 : i32, i32
  }
  func.func @transform_10(%arg0: i32) -> (i32, i32) {
    %c0_i32 = arith.constant 0 : i32
    %c0_i32_0 = arith.constant 0 : i32
    %c0_i32_1 = arith.constant 0 : i32
    return %c0_i32, %c0_i32_0 : i32, i32
  }
  func.func @transform_11(%arg0: i32) -> (i32, i32) {
    %c0_i32 = arith.constant 0 : i32
    %c0_i32_0 = arith.constant 0 : i32
    return %arg0, %c0_i32 : i32, i32
  }
}

</mosaic_0001>

<bundles_post_ra>
// kernel: imu_mlp_forward.1
= control target key start
LH: loop header
LB: loop body
LE: loop exit
PB: predicated region body
PF: predicated region fallthrough
CT: control target
= control target key end

     0   :  { %s1353_s17 = smov 0   ;;  %s1564_s0 = inlined_call_operand.vmem [shape: bf16[32,192], index: 0, kind: input, shape index: {}]   ;;  %s1565_s1 = inlined_call_operand.vmem [shape: bf16[192,128], index: 1, kind: input, shape index: {}]   ;;  %s1566_s2 = inlined_call_operand.vmem [shape: f32[1,128], index: 2, kind: input, shape index: {}]   ;;  %s1567_s3 = inlined_call_operand.vmem [shape: bf16[128,128], index: 3, kind: input, shape index: {}]   ;;  %s1568_s4 = inlined_call_operand.vmem [shape: f32[1,128], index: 4, kind: input, shape index: {}]   ;;  %s1569_s5 = inlined_call_operand.vmem [shape: bf16[128,128], index: 5, kind: input, shape index: {}]   ;;  %s1570_s6 = inlined_call_operand.vmem [shape: f32[1,128], index: 6, kind: input, shape index: {}]   ;;  %s1571_s7 = inlined_call_operand.vmem [shape: bf16[128,128], index: 7, kind: input, shape index: {}]   ;;  %s1572_s8 = inlined_call_operand.vmem [shape: f32[1,128], index: 8, kind: input, shape index: {}]   ;;  %s1573_s9 = inlined_call_operand.vmem [shape: bf16[128,128], index: 9, kind: input, shape index: {}]   ;;  %s1574_s10 = inlined_call_operand.vmem [shape: f32[1,128], index: 10, kind: input, shape index: {}]   ;;  %s1575_s11 = inlined_call_operand.vmem [shape: f32[32,128], index: 11, kind: output, shape index: {}]  }
   0x1 LB: > { %s1046_s18 = sadd.s32 4294967295, %s1288_s17   ;;  %p1050_p0 = scmp.ge.s32.totalorder %s1288_s17, 1  ;;  %s1288_s17 = sphi %s1353_s17, %s21_s17  }
   0x2   : > { %p337_p1 = scmp.lt.s32.totalorder %s1288_s17, 5 }
   0x4   : > { %p338_p2 = pnand %p1050_p0, %p337_p1 }
   0x5   : > { %v1236_v0 = vld [vmem:[%s1565_s1] sm:$0xff] (!%p338_p2)   ;;  %v1290_v1 = vmov (!%p338_p2), 0   ;;  %p376_p3 = scmp.lt.s32.totalorder (!%p338_p2), %s1046_s18, 3  ;;  %v1237_v2 = vld [vmem:[%s1565_s1 + $0x8] sm:$0xff] (!%p338_p2)   ;;  %v1291_v3 = vmov (!%p338_p2), 0.0   ;;  %v1238_v4 = vld [vmem:[%s1565_s1 + $0x10] sm:$0xff] (!%p338_p2)  }
   0x6   : > { %341 = sbr.rel (%p338_p2) target bundleno = 1141 (0x475), region = 64  ;;  %500 = vmatprep.subr.bf16.mxu0 (!%p338_p2), %v1290_v1  ;;  %1145 = vmatprep.subr.bf16.mxu1 (!%p338_p2), %v1291_v3  ;;  %v1239_v5 = vld [vmem:[%s1565_s1 + $0x18] sm:$0xff] (!%p338_p2)   ;;  %vm496_vm0 = vcmask (!%p338_p2), 523264   ;;  %v1250_v8 = vld [vmem:[%s1567_s3] sm:$0xff] (!%p338_p2)   ;;  %v1251_v10 = vld [vmem:[%s1567_s3 + $0x8] sm:$0xff] (!%p338_p2)   ;;  %vm1292_vm1 = vmmov (!%p338_p2), 0  }
   0x7   : > { %501 = vmatpush1.bf16.msra.mxu0 (!%p338_p2), %v1236_v0  ;;  %v1240_v9 = vld [vmem:[%s1565_s1 + $0x20] sm:$0xff] (!%p338_p2)   ;;  %1146 = vmatpush3.bf16.msra.mxu1 (!%p338_p2), %v1250_v8  ;;  %v1241_v11 = vld [vmem:[%s1565_s1 + $0x28] sm:$0xff] (!%p338_p2)   ;;  %v1252_v12 = vld [vmem:[%s1567_s3 + $0x10] sm:$0xff] (!%p338_p2)  }
   0x8   : > { %502 = vmatprep.subr.bf16.mxu0 (!%p338_p2), %v1290_v1  ;;  %1147 = vmatprep.subr.bf16.mxu1 (!%p338_p2), %v1291_v3  ;;  %v1242_v13 = vld [vmem:[%s1565_s1 + $0x30] sm:$0xff] (!%p338_p2)   ;;  %v1253_v14 = vld [vmem:[%s1567_s3 + $0x18] sm:$0xff] (!%p338_p2)   ;;  %v1254_v16 = vld [vmem:[%s1567_s3 + $0x20] sm:$0xff] (!%p338_p2)  }
   0x9   : > { %v1243_v15 = vld [vmem:[%s1565_s1 + $0x38] sm:$0xff] (!%p338_p2)   ;;  %v1244_v17 = vld [vmem:[%s1565_s1 + $0x40] sm:$0xff] (!%p338_p2)   ;;  %v1255_v18 = vld [vmem:[%s1567_s3 + $0x28] sm:$0xff] (!%p338_p2)   ;;  %1161 = vmatprep.mubr.msk.bf16.mxu1 (!%p338_p2), %vm1292_vm1, %v1291_v3 }
   0xa   : > { %v1245_v19 = vld [vmem:[%s1565_s1 + $0x48] sm:$0xff] (!%p338_p2)   ;;  %v1246_v20 = vld [vmem:[%s1565_s1 + $0x50] sm:$0xff] (!%p338_p2)   ;;  %v1247_v21 = vld [vmem:[%s1565_s1 + $0x58] sm:$0xff] (!%p338_p2)  }
   0xb   : > { %503 = vmatpush1.bf16.msra.mxu0 (!%p338_p2), %v1237_v2  ;;  %1148 = vmatpush3.bf16.msra.mxu1 (!%p338_p2), %v1251_v10  ;;  %v1256_v23 = vld [vmem:[%s1567_s3 + $0x30] sm:$0xff] (!%p338_p2)   ;;  %v1257_v24 = vld [vmem:[%s1567_s3 + $0x38] sm:$0xff] (!%p338_p2)   ;;  %v1054_v25 = vld [vmem:[%s1566_s2] ss:$0 sm:$0xff] (!%p338_p2) }
   0xc   : > { %504 = vmatprep.subr.bf16.mxu0 (!%p338_p2), %v1290_v1  ;;  %1149 = vmatprep.subr.bf16.mxu1 (!%p338_p2), %v1291_v3  ;;  %v1258_v32 = vld [vmem:[%s1569_s5] sm:$0xff] (!%p338_p2)   ;;  %v1259_v34 = vld [vmem:[%s1569_s5 + $0x8] sm:$0xff] (!%p338_p2)   ;;  %v1260_v35 = vld [vmem:[%s1569_s5 + $0x10] sm:$0xff] (!%p338_p2)  }
   0xd   : > { %s1577_s18 = smov (!%p376_p3, %s1046_s18), 3  ;;  %v1261_v36 = vld [vmem:[%s1569_s5 + $0x18] sm:$0xff]   ;;  %v1262_v37 = vld [vmem:[%s1569_s5 + $0x20] sm:$0xff]   ;;  %v1263_v38 = vld [vmem:[%s1569_s5 + $0x28] sm:$0xff]  }
   0xe   : > { %s1108_s25 = sshll.u32 %s1577_s18, 3  ;;  %v1264_v39 = vld [vmem:[%s1569_s5 + $0x30] sm:$0xff]   ;;  %v1265_v40 = vld [vmem:[%s1569_s5 + $0x38] sm:$0xff]   ;;  %v1266_v41 = vld [vmem:[%s1571_s7] sm:$0xff]  }
   0xf   : > { %s380_s28 = scalar_lea.vmem %s1564_s0, %s1108_s25  ;;  %505 = vmatpush1.bf16.msra.mxu0 %v1238_v4  ;;  %1150 = vmatpush3.bf16.msra.mxu1 %v1252_v12  ;;  %v1267_v42 = vld [vmem:[%s1571_s7 + $0x8] sm:$0xff]   ;;  %v1268_v43 = vld [vmem:[%s1571_s7 + $0x10] sm:$0xff]   ;;  %v1269_v44 = vld [vmem:[%s1571_s7 + $0x18] sm:$0xff]   ;;  %s384_s27 = scalar_lea.vmem %s1575_s11, %s1108_s25 }
  0x10   : > { %506 = vmatprep.subr.bf16.mxu0 %v1290_v1  ;;  %v386_v6 = vld [vmem:[%s380_s28] sm:$0xff]  ;;  %1151 = vmatprep.subr.bf16.mxu1 %v1291_v3  ;;  %v1271_v46 = vld [vmem:[%s1571_s7 + $0x28] sm:$0xff]   ;;  %v1272_v55 = vld [vmem:[%s1571_s7 + $0x30] sm:$0xff]  }
  0x11   : > { %v1056_v7 = vcombine.high %v386_v6, %v386_v6  ;;  %v1055_v22 = vcombine.low %v386_v6, %v386_v6  ;;  %v1270_v45 = vld [vmem:[%s1571_s7 + $0x20] sm:$0xff]   ;;  %v1273_v56 = vld [vmem:[%s1571_s7 + $0x38] sm:$0xff]   ;;  %v1275_v58 = vld [vmem:[%s1573_s9 + $0x8] sm:$0xff]  }
  0x12   : > { %v1070_v47 = vld [vmem:[%s1568_s4] ss:$0 sm:$0xff]  ;;  %v1276_v59 = vld [vmem:[%s1573_s9 + $0x10] sm:$0xff]   ;;  %v1277_v60 = vld [vmem:[%s1573_s9 + $0x18] sm:$0xff]  }
  0x13   : > { %507 = vmatpush1.bf16.msra.mxu0 %v1239_v5  ;;  %1069 = vmatprep.mubr.msk.bf16.mxu0 %vm496_vm0, %v1056_v7  ;;  %v1274_v57 = vld [vmem:[%s1573_s9] sm:$0xff]   ;;  %v1279_v62 = vld [vmem:[%s1573_s9 + $0x28] sm:$0xff]   ;;  %v1280_v8 = vld [vmem:[%s1573_s9 + $0x30] sm:$0xff]  }
  0x14   : > { %508 = vmatprep.subr.bf16.mxu0 %v1290_v1  ;;  %1152 = vmatpush3.bf16.msra.mxu1 %v1253_v14  ;;  %v1278_v61 = vld [vmem:[%s1573_s9 + $0x20] sm:$0xff]  }
  0x15   : > { %1153 = vmatprep.subr.bf16.mxu1 %v1291_v3  ;;  %v1079_v63 = vld [vmem:[%s1570_s6] ss:$0 sm:$0xff] }
  0x16   : > { %v1088_v10 = vld [vmem:[%s1572_s8] ss:$0 sm:$0xff] }
  0x17   : > { %509 = vmatpush1.bf16.msra.mxu0 %v1240_v9  ;;  %v1281_v9 = vld [vmem:[%s1573_s9 + $0x38] sm:$0xff]  }
  0x18   : > { %510 = vmatprep.subr.bf16.mxu0 %v1290_v1  ;;  %1154 = vmatpush3.bf16.msra.mxu1 %v1254_v16 }
  0x19   : > { %1155 = vmatprep.subr.bf16.mxu1 %v1291_v3 }
  0x1b   : > { %511 = vmatpush1.bf16.msra.mxu0 %v1241_v11 }
  0x1c   : > { %512 = vmatprep.subr.bf16.mxu0 %v1290_v1  ;;  %1156 = vmatpush3.bf16.msra.mxu1 %v1255_v18 }
  0x1d   : > { %1157 = vmatprep.subr.bf16.mxu1 %v1291_v3 }
  0x1f   : > { %513 = vmatpush1.bf16.msra.mxu0 %v1242_v13 }
  0x20   : > { %514 = vmatprep.subr.bf16.mxu0 %v1290_v1  ;;  %1158 = vmatpush3.bf16.msra.mxu1 %v1256_v23 }
  0x21   : > { %1159 = vmatprep.subr.bf16.mxu1 %v1291_v3 }
  0x23   : > { %515 = vmatpush1.bf16.msra.mxu0 %v1243_v15 }
  0x24   : > { %516 = vmatprep.subr.bf16.mxu0 %v1290_v1  ;;  %1160 = vmatpush3.bf16.msra.mxu1 %v1257_v24 }
  0x25   : > { %1165 = vmatprep.subr.bf16.mxu1 %v1291_v3 }
  0x27   : > { %517 = vmatpush1.bf16.msra.mxu0 %v1244_v17 }
  0x28   : > { %518 = vmatprep.subr.bf16.mxu0 %v1290_v1 }
  0x2b   : > { %519 = vmatpush1.bf16.msra.mxu0 %v1245_v19 }
  0x2c   : > { %520 = vmatprep.subr.bf16.mxu0 %v1290_v1 }
  0x2f   : > { %521 = vmatpush1.bf16.msra.mxu0 %v1246_v20 }
  0x30   : > { %522 = vmatprep.subr.bf16.mxu0 %v1290_v1 }
  0x33   : > { %523 = vmatpush1.bf16.msra.mxu0 %v1247_v21 }
  0x34   : > { %1185 = vmatprep.subr.bf16.mxu0 %v1291_v3 }
  0x36   : > { %533 = vmatmul.mubr.bf16.vlgmr.msra.gmra.mrb[0].mxu0 %v1055_v22 }
  0x37   : > { %1201 = vmatprep.mubr.msk.bf16.mxu0 %vm1292_vm1, %v1291_v3  ;;  %1186 = vmatpush3.bf16.msra.mxu0 %v1266_v41 }
  0x38   : > { %1187 = vmatprep.subr.bf16.mxu0 %v1291_v3 }
  0x3b   : > { %1188 = vmatpush3.bf16.msra.mxu0 %v1267_v42 }
  0x3c   : > { %1189 = vmatprep.subr.bf16.mxu0 %v1291_v3 }
  0x3f   : > { %1190 = vmatpush3.bf16.msra.mxu0 %v1268_v43 }
  0x40   : > { %1191 = vmatprep.subr.bf16.mxu0 %v1291_v3 }
  0x43   : > { %1192 = vmatpush3.bf16.msra.mxu0 %v1269_v44 }
  0x44   : > { %1193 = vmatprep.subr.bf16.mxu0 %v1291_v3 }
  0x47   : > { %1194 = vmatpush3.bf16.msra.mxu0 %v1270_v45 }
  0x48   : > { %1195 = vmatprep.subr.bf16.mxu0 %v1291_v3 }
  0x4b   : > { %1196 = vmatpush3.bf16.msra.mxu0 %v1271_v46 }
  0x4c   : > { %1197 = vmatprep.subr.bf16.mxu0 %v1291_v3 }
  0x4f   : > { %1198 = vmatpush3.bf16.msra.mxu0 %v1272_v55 }
  0x50   : > { %1199 = vmatprep.subr.bf16.mxu0 %v1291_v3 }
  0x53   : > { %1200 = vmatpush3.bf16.msra.mxu0 %v1273_v56 }
 0x109   : > { %v534_v26 = vpop.f32.mrb[0].mxu0 }
 0x10a   : > { %v535_v27 = vadd.f32 %v1054_v25, %v534_v26  ;;  %v536_v28 = vpop.f32.mrb[1].mxu0 }
 0x10b   : > { %v537_v29 = vpop.f32.mrb[2].mxu0 }
 0x10c   : > { %v540_v30 = vmax.f32 %v535_v27, 0.0  ;;  %v538_v31 = vpop.f32.mrb[3].mxu0 }
 0x10e   : > { %v541_v33 = vpack.c.bf16 %v540_v30, %v540_v30 }
 0x110   : > { %1162 = vmatmul.mubr.bf16.vlgmr.msra.gmra.mrb[0].mxu1 %v541_v33 }
 0x111   : > { %1166 = vmatpush3.bf16.msra.mxu1 %v1258_v32  ;;  %1181 = vmatprep.mubr.msk.bf16.mxu1 %vm1292_vm1, %v1291_v3 }
 0x112   : > { %1167 = vmatprep.subr.bf16.mxu1 %v1291_v3 }
 0x115   : > { %1168 = vmatpush3.bf16.msra.mxu1 %v1259_v34 }
 0x116   : > { %1169 = vmatprep.subr.bf16.mxu1 %v1291_v3 }
 0x119   : > { %1170 = vmatpush3.bf16.msra.mxu1 %v1260_v35 }
 0x11a   : > { %1171 = vmatprep.subr.bf16.mxu1 %v1291_v3 }
 0x11d   : > { %1172 = vmatpush3.bf16.msra.mxu1 %v1261_v36 }
 0x11e   : > { %1173 = vmatprep.subr.bf16.mxu1 %v1291_v3 }
 0x121   : > { %1174 = vmatpush3.bf16.msra.mxu1 %v1262_v37 }
 0x122   : > { %1175 = vmatprep.subr.bf16.mxu1 %v1291_v3 }
 0x125   : > { %1176 = vmatpush3.bf16.msra.mxu1 %v1263_v38 }
 0x126   : > { %1177 = vmatprep.subr.bf16.mxu1 %v1291_v3 }
 0x129   : > { %1178 = vmatpush3.bf16.msra.mxu1 %v1264_v39 }
 0x12a   : > { %1179 = vmatprep.subr.bf16.mxu1 %v1291_v3 }
 0x12d   : > { %1180 = vmatpush3.bf16.msra.mxu1 %v1265_v40 }
 0x12e   : > { %1205 = vmatprep.subr.bf16.mxu1 %v1291_v3 }
 0x1e3   : > { %v647_v48 = vpop.f32.mrb[0].mxu1 }
 0x1e4   : > { %v648_v49 = vadd.f32 %v1070_v47, %v647_v48  ;;  %v1163_v50 = vpop.f32.mrb[1].mxu1 }
 0x1e5   : > { %v650_v51 = vpop.f32.mrb[2].mxu1 }
 0x1e6   : > { %v653_v52 = vmax.f32 %v648_v49, 0.0  ;;  %v1164_v53 = vpop.f32.mrb[3].mxu1 }
 0x1e8   : > { %v654_v54 = vpack.c.bf16 %v653_v52, %v653_v52 }
 0x1ea   : > { %1182 = vmatmul.mubr.bf16.vlgmr.msra.gmra.mrb[4].mxu1 %v654_v54 }
 0x1eb   : > { %1221 = vmatprep.mubr.msk.bf16.mxu1 %vm1292_vm1, %v1291_v3  ;;  %1206 = vmatpush3.bf16.msra.mxu1 %v1274_v57 }
 0x1ec   : > { %1207 = vmatprep.subr.bf16.mxu1 %v1291_v3 }
 0x1ef   : > { %1208 = vmatpush3.bf16.msra.mxu1 %v1275_v58 }
 0x1f0   : > { %1209 = vmatprep.subr.bf16.mxu1 %v1291_v3 }
 0x1f3   : > { %1210 = vmatpush3.bf16.msra.mxu1 %v1276_v59 }
 0x1f4   : > { %1211 = vmatprep.subr.bf16.mxu1 %v1291_v3 }
 0x1f7   : > { %1212 = vmatpush3.bf16.msra.mxu1 %v1277_v60 }
 0x1f8   : > { %1213 = vmatprep.subr.bf16.mxu1 %v1291_v3 }
 0x1fb   : > { %1214 = vmatpush3.bf16.msra.mxu1 %v1278_v61 }
 0x1fc   : > { %1215 = vmatprep.subr.bf16.mxu1 %v1291_v3 }
 0x1ff   : > { %1216 = vmatpush3.bf16.msra.mxu1 %v1279_v62 }
 0x200   : > { %1217 = vmatprep.subr.bf16.mxu1 %v1291_v3 }
 0x203   : > { %1218 = vmatpush3.bf16.msra.mxu1 %v1280_v8 }
 0x204   : > { %1219 = vmatprep.subr.bf16.mxu1 %v1291_v3  ;;  %v1097_v3 = vld [vmem:[%s1574_s10] ss:$0 sm:$0xff] }
 0x207   : > { %1220 = vmatpush3.bf16.msra.mxu1 %v1281_v9 }
 0x2bd   : > { %v760_v0 = vpop.f32.mrb[4].mxu1 }
 0x2be   : > { %v761_v1 = vadd.f32 %v1079_v63, %v760_v0  ;;  %v1183_v2 = vpop.f32.mrb[5].mxu1 }
 0x2bf   : > { %v763_v4 = vpop.f32.mrb[6].mxu1 }
 0x2c0   : > { %v766_v5 = vmax.f32 %v761_v1, 0.0  ;;  %v1184_v6 = vpop.f32.mrb[7].mxu1 }
 0x2c2   : > { %v767_v7 = vpack.c.bf16 %v766_v5, %v766_v5 }
 0x2c4   : > { %1202 = vmatmul.mubr.bf16.vlgmr.msra.gmra.mrb[4].mxu0 %v767_v7 }
 0x397   : > { %v873_v11 = vpop.f32.mrb[4].mxu0 }
 0x398   : > { %v874_v12 = vadd.f32 %v1088_v10, %v873_v11  ;;  %v1203_v13 = vpop.f32.mrb[5].mxu0 }
 0x399   : > { %v876_v14 = vpop.f32.mrb[6].mxu0 }
 0x39a   : > { %v879_v15 = vmax.f32 %v874_v12, 0.0  ;;  %v1204_v16 = vpop.f32.mrb[7].mxu0 }
 0x39c   : > { %v880_v17 = vpack.c.bf16 %v879_v15, %v879_v15 }
 0x39e   : > { %1222 = vmatmul.mubr.bf16.vlgmr.msra.gmra.mrb[8].mxu1 %v880_v17 }
 0x471   : > { %v986_v18 = vpop.f32.mrb[8].mxu1 }
 0x472   : > { %v987_v19 = vadd.f32 %v1097_v3, %v986_v18  ;;  %v1223_v20 = vpop.f32.mrb[9].mxu1 }
 0x473   : > { %v989_v21 = vpop.f32.mrb[10].mxu1 }
 0x474   : > { %992 = vst [vmem:[%s384_s27] sm:$0xff] %v987_v19  ;;  %v1224_v22 = vpop.f32.mrb[11].mxu1 }
 0x475 PF: > { %s21_s17 = sadd.s32 1, %s1288_s17  }
 0x476   : > { %p18_p4 = scmp.ge.s32.totalorder %s21_s17, 6  }
 0x478   :  { %20 = sbr.rel (!%p18_p4) target bundleno = 1 (0x1), region = 94 }

</bundles_post_ra>
